<compile_context>
chip_gen: v5e
topology: v5e:2x2
jax: 0.10.0
libtpu: 0.0.40
codegen_flags: <defaults>
</compile_context>

<pallas_src>
import functools

import jax
import jax.numpy as jnp
import numpy as np
from jax.experimental import pallas as pl
from jax.experimental.pallas import tpu as pltpu

# ---------------------------------------------------------------------------
# Static configuration (what CUDAKernel.__init__ derives from its list of
# SegmentedTensorProducts). The descriptor preprocessing in __init__
# (move_operand / flatten / consolidate / split_mode) is host-side metadata
# manipulation with no runtime compute, so the resulting static path table
# (path_segment_indices + path_coefficients) is provided directly.
# ---------------------------------------------------------------------------
U = 128                  # shared segment size ("self.u")
NUM_IN_SEGMENTS = 4      # x1 segments
NUM_COUPLINGS = 3        # x0 segments
NUM_OUT_SEGMENTS = 2     # output segments
NUM_X0 = 5               # rows of the x0 table
BATCH = 12               # deliberately NOT a multiple of 8 -> exercises masked tail
TB_DEFAULT = 1024        # batch rows per grid step (tunable)

# Each path: (x1 segment indices (degree <= correlation),
#             x0 coupling segment index, output segment index, coefficient)
PATHS = (
    ((0,),        0, 0,  1.00),
    ((2,),        1, 1,  0.50),
    ((0, 1),      1, 0,  0.25),
    ((1, 3),      2, 1, -0.70),
    ((2, 2),      0, 1,  1.50),
    ((0, 1, 2),   0, 0,  0.30),
    ((3, 3, 1),   2, 0, -1.10),
    ((0, 2, 3),   1, 1,  0.80),
)

# TODO(synk): cue.SegmentedTensorProduct descriptor preprocessing has no
# runtime compute; it is replaced by the static PATHS table above.


def _group_paths(paths):
    """Group paths by (coupling, out_segment); sort for monomial CSE locality."""
    groups = {}
    for in_idx, cpl, out_idx, coeff in paths:
        key = tuple(sorted(in_idx))
        groups.setdefault((cpl, out_idx), []).append((key, float(coeff)))
    grouped = []
    for (cpl, out_idx), terms in groups.items():
        terms = tuple(sorted(terms))
        grouped.append((terms[0][0], (cpl, out_idx), terms))
    # Order groups by their lexicographically smallest monomial key so groups
    # sharing monomial prefixes are adjacent (short live ranges for CSE temps).
    grouped.sort()
    return tuple((k, t) for _, k, t in grouped)


PATH_GROUPS = _group_paths(PATHS)


def _cdiv(a, b):
    return -(-a // b)


def _round_up(n, m):
    return _cdiv(n, m) * m


def _stc_kernel(i0_ref, x0_ref, x1_ref, o_ref):
    """Symmetric tensor contraction for one batch tile (lane-flattened segs)."""
    tb = x1_ref.shape[0]
    i0 = i0_ref[...]  # (tb, 1) int32; garbage on masked tail rows is harmless.

    # --- CSE'd monomials of x1 segments (slices taken directly from the ref,
    #     at 128-lane boundaries, upcast per segment — no full-tile temp). ---
    monos = {}

    def monomial(key):
        if key in monos:
            return monos[key]
        if len(key) == 0:
            m = jnp.ones((tb, U), jnp.float32)
        elif len(key) == 1:
            j = key[0]
            m = x1_ref[:, j * U:(j + 1) * U].astype(jnp.float32)
        else:
            j = key[-1]
            m = monomial(key[:-1]) * x1_ref[:, j * U:(j + 1) * U].astype(jnp.float32)
        monos[key] = m
        return m

    # --- Exact x0[i0] gather via VPU compare+select chain, lazily per used
    #     coupling segment. Unmatched / garbage i0 falls back to row 0. ---
    x0_gathered = {}

    def x0_seg(cpl):
        if cpl in x0_gathered:
            return x0_gathered[cpl]
        col = x0_ref[:, cpl * U:(cpl + 1) * U].astype(jnp.float32)  # (NUM_X0, U)
        g = jnp.broadcast_to(col[0:1, :], (tb, U))
        for r in range(1, NUM_X0):
            g = jnp.where(i0 == r, col[r:r + 1, :], g)
        x0_gathered[cpl] = g
        return g

    # Group-wise Horner: acc[out] += x0g[cpl] * sum_p coeff_p * monomial_p
    acc = [None] * NUM_OUT_SEGMENTS
    for (cpl, out_idx), terms in PATH_GROUPS:
        poly = None
        for key, coeff in terms:
            t = monomial(key)
            if coeff != 1.0:
                t = t * jnp.float32(coeff)
            poly = t if poly is None else poly + t
        contrib = x0_seg(cpl) * poly
        acc[out_idx] = contrib if acc[out_idx] is None else acc[out_idx] + contrib

    # Lane-dense, 128-aligned stores into the flattened output block.
    for out_idx in range(NUM_OUT_SEGMENTS):
        a = acc[out_idx]
        if a is None:
            a = jnp.zeros((tb, U), jnp.float32)
        o_ref[:, out_idx * U:(out_idx + 1) * U] = a.astype(o_ref.dtype)


@functools.partial(jax.jit, static_argnames=("tb",))
def symmetric_tensor_contraction(x0, i0, x1, *, tb=TB_DEFAULT):
    """Mirror of CUDAKernel.forward(x0, i0, x1) -> (batch, x2_size)."""
    assert x0.ndim == 2, f"Expected shape (num_x0, x0_size), got {x0.shape}"
    assert x1.ndim == 2, f"Expected shape (batch, x1_size), got {x1.shape}"
    assert i0.ndim == 1, f"Expected shape (batch,), got {i0.shape}"
    assert x0.shape == (NUM_X0, NUM_COUPLINGS * U)
    assert x1.shape[1] == NUM_IN_SEGMENTS * U
    assert i0.shape[0] == x1.shape[0]

    batch = x1.shape[0]
    out_dtype = x1.dtype
    in_itemsize = jnp.dtype(x1.dtype).itemsize
    out_itemsize = jnp.dtype(out_dtype).itemsize

    i0_2d = i0.astype(jnp.int32).reshape(batch, 1)

    # --- Tile selection -----------------------------------------------------
    # sublane multiple: 8 for 4-byte dtypes, 16 for 2-byte (bf16) dtypes.
    mult = 16 if in_itemsize < 4 else 8
    tb_eff = max(mult, (min(tb, batch) // mult) * mult)
    # Guarantee several grid steps so ("parallel",) can shard the batch axis
    # across both TensorCores on v7x (harmless on single-core v5e/v6e).
    tb_eff = min(tb_eff, max(mult, _round_up(_cdiv(batch, 4), mult)))
    if tb_eff >= batch:
        tb_eff = batch          # full-extent block (always a legal block shape)
    grid = _cdiv(batch, tb_eff)  # partial last block: output rows masked by Pallas

    # --- VMEM budget (double-buffered IO + resident x0 + live f32 temps) ----
    io_bytes = 2 * tb_eff * (NUM_IN_SEGMENTS * U * in_itemsize
                             + NUM_OUT_SEGMENTS * U * out_itemsize
                             + 128 * 4)                     # i0 column, lane-padded
    x0_bytes = 2 * 8 * NUM_COUPLINGS * U * jnp.dtype(x0.dtype).itemsize
    temp_bytes = 16 * tb_eff * U * 4                        # monomials/gather/acc
    vmem_limit = int(min(48 * 2**20,
                         max(16 * 2**20,
                             io_bytes + x0_bytes + temp_bytes + (4 << 20))))

    # --- Cost hint for the XLA scheduler -------------------------------------
    total_deg = sum(len(p[0]) for p in PATHS)
    cost = pl.CostEstimate(
        flops=batch * U * (2 * len(PATHS) + total_deg + NUM_X0 * NUM_COUPLINGS),
        transcendentals=0,
        bytes_accessed=(batch * (NUM_IN_SEGMENTS * U * in_itemsize
                                 + NUM_OUT_SEGMENTS * U * out_itemsize + 4)
                        + x0.size * jnp.dtype(x0.dtype).itemsize),
    )

    grid_spec = pltpu.PrefetchScalarGridSpec(
        num_scalar_prefetch=0,
        grid=(grid,),
        in_specs=[
            # i0 tile as an int32 VMEM column (drives the select-chain gather)
            pl.BlockSpec((tb_eff, 1), lambda b: (b, 0)),
            # full x0 table resident in VMEM every step (tiny, constant map)
            pl.BlockSpec((NUM_X0, NUM_COUPLINGS * U), lambda b: (0, 0)),
            # lane-flattened per-step batch tile of x1
            pl.BlockSpec((tb_eff, NUM_IN_SEGMENTS * U), lambda b: (b, 0)),
        ],
        out_specs=pl.BlockSpec((tb_eff, NUM_OUT_SEGMENTS * U), lambda b: (b, 0)),
    )

    out = pl.pallas_call(
        _stc_kernel,
        out_shape=jax.ShapeDtypeStruct((batch, NUM_OUT_SEGMENTS * U), out_dtype),
        grid_spec=grid_spec,
        compiler_params=pltpu.CompilerParams(
            dimension_semantics=("parallel",),
            vmem_limit_bytes=vmem_limit),
        cost_estimate=cost,
    )(i0_2d, x0, x1)

    return out


def _reference(x0, i0, x1):
    """Pure-JAX reference of the same contraction."""
    x0r = x0.reshape(x0.shape[0], NUM_COUPLINGS, U)
    x1r = x1.reshape(x1.shape[0], NUM_IN_SEGMENTS, U)
    x0g = x0r[i0]  # (batch, NUM_COUPLINGS, U)
    out = jnp.zeros((x1.shape[0], NUM_OUT_SEGMENTS, U), jnp.float32)
    for in_idx, cpl, out_idx, coeff in PATHS:
        term = jnp.float32(coeff) * x0g[:, cpl, :].astype(jnp.float32)
        for j in in_idx:
            term = term * x1r[:, j, :].astype(jnp.float32)
        out = out.at[:, out_idx, :].add(term)
    return out.reshape(x1.shape[0], NUM_OUT_SEGMENTS * U).astype(x1.dtype)


if __name__ == "__main__":
    key = jax.random.PRNGKey(0)
    k0, k1, k2, k3, k4 = jax.random.split(key, 5)

    # Case 1: small batch, not a multiple of 8 (exercises masked tail block).
    x0 = jax.random.normal(k0, (NUM_X0, NUM_COUPLINGS * U), dtype=jnp.float32)
    x1 = jax.random.normal(k1, (BATCH, NUM_IN_SEGMENTS * U), dtype=jnp.float32)
    i0 = jax.random.randint(k2, (BATCH,), 0, NUM_X0, dtype=jnp.int32)

    out = jax.block_until_ready(symmetric_tensor_contraction(x0, i0, x1))
    ref = _reference(x0, i0, x1)
    np.testing.assert_allclose(np.asarray(out), np.asarray(ref),
                               rtol=2e-5, atol=2e-5)
    assert out.shape == (BATCH, NUM_OUT_SEGMENTS * U)

    # Case 2: multi-step grid with a partial last block (batch=40, tb=16).
    b2 = 40
    x1b = jax.random.normal(k3, (b2, NUM_IN_SEGMENTS * U), dtype=jnp.float32)
    i0b = jax.random.randint(k4, (b2,), 0, NUM_X0, dtype=jnp.int32)
    out2 = jax.block_until_ready(
        symmetric_tensor_contraction(x0, i0b, x1b, tb=16))
    ref2 = _reference(x0, i0b, x1b)
    np.testing.assert_allclose(np.asarray(out2), np.asarray(ref2),
                               rtol=2e-5, atol=2e-5)
    assert out2.shape == (b2, NUM_OUT_SEGMENTS * U)

    # Case 3: bf16 I/O path (halves HBM traffic; math still f32 in-kernel).
    x0h = x0.astype(jnp.bfloat16)
    x1h = x1b[:24].astype(jnp.bfloat16)
    i0h = i0b[:24]
    out3 = jax.block_until_ready(symmetric_tensor_contraction(x0h, i0h, x1h))
    ref3 = _reference(x0h, i0h, x1h)
    np.testing.assert_allclose(np.asarray(out3, dtype=np.float32),
                               np.asarray(ref3, dtype=np.float32),
                               rtol=2e-2, atol=2e-2)
    assert out3.dtype == jnp.bfloat16

    print("KERNEL_OK")
</pallas_src>

<mosaic_0001>
module attributes {stable_mosaic.version = 11 : i64} {
  func.func @_stc_kernel(%arg0: i32, %arg1: memref<8x1xi32, #tpu.memory_space<vmem>>, %arg2: memref<5x384xf32, #tpu.memory_space<vmem>>, %arg3: memref<8x512xf32, #tpu.memory_space<vmem>>, %arg4: memref<8x256xf32, #tpu.memory_space<vmem>>) attributes {dimension_semantics = [#tpu.dimension_semantics<parallel>], iteration_bounds = array<i64: 2>, scalar_prefetch = 0 : i64, scratch_operands = 0 : i64, tpu.core_type = #tpu.core_type<tc>, window_params = [{transform_indices = @transform_0, window_bounds = array<i64: 8, 1>}, {pipeline_mode = #tpu.pipeline_mode<synchronous>, transform_indices = @transform_1, window_bounds = array<i64: 5, 384>}, {transform_indices = @transform_2, window_bounds = array<i64: 8, 512>}, {transform_indices = @transform_3, window_bounds = array<i64: 8, 256>}]} {
    %c0 = arith.constant 0 : index
    %c0_0 = arith.constant 0 : index
    %0 = vector.load %arg1[%c0, %c0_0] : memref<8x1xi32, #tpu.memory_space<vmem>>, vector<8x1xi32>
    %c0_1 = arith.constant 0 : index
    %c0_2 = arith.constant 0 : index
    %1 = vector.load %arg3[%c0_1, %c0_2] : memref<8x512xf32, #tpu.memory_space<vmem>>, vector<8x128xf32>
    %c0_3 = arith.constant 0 : index
    %c128 = arith.constant 128 : index
    %2 = vector.load %arg3[%c0_3, %c128] : memref<8x512xf32, #tpu.memory_space<vmem>>, vector<8x128xf32>
    %3 = arith.mulf %1, %2 : vector<8x128xf32>
    %c0_4 = arith.constant 0 : index
    %c256 = arith.constant 256 : index
    %4 = vector.load %arg3[%c0_4, %c256] : memref<8x512xf32, #tpu.memory_space<vmem>>, vector<8x128xf32>
    %5 = arith.mulf %3, %4 : vector<8x128xf32>
    %cst = arith.constant 3.000000e-01 : f32
    %6 = vector.broadcast %cst : f32 to vector<8x128xf32>
    %7 = arith.mulf %5, %6 : vector<8x128xf32>
    %8 = arith.addf %1, %7 : vector<8x128xf32>
    %c0_5 = arith.constant 0 : index
    %c0_6 = arith.constant 0 : index
    %9 = vector.load %arg2[%c0_5, %c0_6] : memref<5x384xf32, #tpu.memory_space<vmem>>, vector<5x128xf32>
    %10 = vector.extract_strided_slice %9 {offsets = [0, 0], sizes = [1, 128], strides = [1, 1]} : vector<5x128xf32> to vector<1x128xf32>
    %11 = vector.shape_cast %10 : vector<1x128xf32> to vector<1x128xf32>
    %12 = vector.broadcast %11 : vector<1x128xf32> to vector<8x128xf32>
    %c1_i32 = arith.constant 1 : i32
    %13 = vector.broadcast %c1_i32 : i32 to vector<8x1xi32>
    %14 = arith.cmpi eq, %0, %13 : vector<8x1xi32>
    %15 = vector.extract_strided_slice %9 {offsets = [1, 0], sizes = [1, 128], strides = [1, 1]} : vector<5x128xf32> to vector<1x128xf32>
    %16 = vector.shape_cast %14 : vector<8x1xi1> to vector<8x1xi1>
    %17 = vector.broadcast %16 : vector<8x1xi1> to vector<8x128xi1>
    %18 = vector.shape_cast %15 : vector<1x128xf32> to vector<1x128xf32>
    %19 = vector.broadcast %18 : vector<1x128xf32> to vector<8x128xf32>
    %20 = arith.select %17, %19, %12 : vector<8x128xi1>, vector<8x128xf32>
    %c2_i32 = arith.constant 2 : i32
    %21 = vector.broadcast %c2_i32 : i32 to vector<8x1xi32>
    %22 = arith.cmpi eq, %0, %21 : vector<8x1xi32>
    %23 = vector.extract_strided_slice %9 {offsets = [2, 0], sizes = [1, 128], strides = [1, 1]} : vector<5x128xf32> to vector<1x128xf32>
    %24 = vector.shape_cast %22 : vector<8x1xi1> to vector<8x1xi1>
    %25 = vector.broadcast %24 : vector<8x1xi1> to vector<8x128xi1>
    %26 = vector.shape_cast %23 : vector<1x128xf32> to vector<1x128xf32>
    %27 = vector.broadcast %26 : vector<1x128xf32> to vector<8x128xf32>
    %28 = arith.select %25, %27, %20 : vector<8x128xi1>, vector<8x128xf32>
    %c3_i32 = arith.constant 3 : i32
    %29 = vector.broadcast %c3_i32 : i32 to vector<8x1xi32>
    %30 = arith.cmpi eq, %0, %29 : vector<8x1xi32>
    %31 = vector.extract_strided_slice %9 {offsets = [3, 0], sizes = [1, 128], strides = [1, 1]} : vector<5x128xf32> to vector<1x128xf32>
    %32 = vector.shape_cast %30 : vector<8x1xi1> to vector<8x1xi1>
    %33 = vector.broadcast %32 : vector<8x1xi1> to vector<8x128xi1>
    %34 = vector.shape_cast %31 : vector<1x128xf32> to vector<1x128xf32>
    %35 = vector.broadcast %34 : vector<1x128xf32> to vector<8x128xf32>
    %36 = arith.select %33, %35, %28 : vector<8x128xi1>, vector<8x128xf32>
    %c4_i32 = arith.constant 4 : i32
    %37 = vector.broadcast %c4_i32 : i32 to vector<8x1xi32>
    %38 = arith.cmpi eq, %0, %37 : vector<8x1xi32>
    %39 = vector.extract_strided_slice %9 {offsets = [4, 0], sizes = [1, 128], strides = [1, 1]} : vector<5x128xf32> to vector<1x128xf32>
    %40 = vector.shape_cast %38 : vector<8x1xi1> to vector<8x1xi1>
    %41 = vector.broadcast %40 : vector<8x1xi1> to vector<8x128xi1>
    %42 = vector.shape_cast %39 : vector<1x128xf32> to vector<1x128xf32>
    %43 = vector.broadcast %42 : vector<1x128xf32> to vector<8x128xf32>
    %44 = arith.select %41, %43, %36 : vector<8x128xi1>, vector<8x128xf32>
    %45 = arith.mulf %44, %8 : vector<8x128xf32>
    %cst_7 = arith.constant 2.500000e-01 : f32
    %46 = vector.broadcast %cst_7 : f32 to vector<8x128xf32>
    %47 = arith.mulf %3, %46 : vector<8x128xf32>
    %c0_8 = arith.constant 0 : index
    %c128_9 = arith.constant 128 : index
    %48 = vector.load %arg2[%c0_8, %c128_9] : memref<5x384xf32, #tpu.memory_space<vmem>>, vector<5x128xf32>
    %49 = vector.extract_strided_slice %48 {offsets = [0, 0], sizes = [1, 128], strides = [1, 1]} : vector<5x128xf32> to vector<1x128xf32>
    %50 = vector.shape_cast %49 : vector<1x128xf32> to vector<1x128xf32>
    %51 = vector.broadcast %50 : vector<1x128xf32> to vector<8x128xf32>
    %c1_i32_10 = arith.constant 1 : i32
    %52 = vector.broadcast %c1_i32_10 : i32 to vector<8x1xi32>
    %53 = arith.cmpi eq, %0, %52 : vector<8x1xi32>
    %54 = vector.extract_strided_slice %48 {offsets = [1, 0], sizes = [1, 128], strides = [1, 1]} : vector<5x128xf32> to vector<1x128xf32>
    %55 = vector.shape_cast %53 : vector<8x1xi1> to vector<8x1xi1>
    %56 = vector.broadcast %55 : vector<8x1xi1> to vector<8x128xi1>
    %57 = vector.shape_cast %54 : vector<1x128xf32> to vector<1x128xf32>
    %58 = vector.broadcast %57 : vector<1x128xf32> to vector<8x128xf32>
    %59 = arith.select %56, %58, %51 : vector<8x128xi1>, vector<8x128xf32>
    %c2_i32_11 = arith.constant 2 : i32
    %60 = vector.broadcast %c2_i32_11 : i32 to vector<8x1xi32>
    %61 = arith.cmpi eq, %0, %60 : vector<8x1xi32>
    %62 = vector.extract_strided_slice %48 {offsets = [2, 0], sizes = [1, 128], strides = [1, 1]} : vector<5x128xf32> to vector<1x128xf32>
    %63 = vector.shape_cast %61 : vector<8x1xi1> to vector<8x1xi1>
    %64 = vector.broadcast %63 : vector<8x1xi1> to vector<8x128xi1>
    %65 = vector.shape_cast %62 : vector<1x128xf32> to vector<1x128xf32>
    %66 = vector.broadcast %65 : vector<1x128xf32> to vector<8x128xf32>
    %67 = arith.select %64, %66, %59 : vector<8x128xi1>, vector<8x128xf32>
    %c3_i32_12 = arith.constant 3 : i32
    %68 = vector.broadcast %c3_i32_12 : i32 to vector<8x1xi32>
    %69 = arith.cmpi eq, %0, %68 : vector<8x1xi32>
    %70 = vector.extract_strided_slice %48 {offsets = [3, 0], sizes = [1, 128], strides = [1, 1]} : vector<5x128xf32> to vector<1x128xf32>
    %71 = vector.shape_cast %69 : vector<8x1xi1> to vector<8x1xi1>
    %72 = vector.broadcast %71 : vector<8x1xi1> to vector<8x128xi1>
    %73 = vector.shape_cast %70 : vector<1x128xf32> to vector<1x128xf32>
    %74 = vector.broadcast %73 : vector<1x128xf32> to vector<8x128xf32>
    %75 = arith.select %72, %74, %67 : vector<8x128xi1>, vector<8x128xf32>
    %c4_i32_13 = arith.constant 4 : i32
    %76 = vector.broadcast %c4_i32_13 : i32 to vector<8x1xi32>
    %77 = arith.cmpi eq, %0, %76 : vector<8x1xi32>
    %78 = vector.extract_strided_slice %48 {offsets = [4, 0], sizes = [1, 128], strides = [1, 1]} : vector<5x128xf32> to vector<1x128xf32>
    %79 = vector.shape_cast %77 : vector<8x1xi1> to vector<8x1xi1>
    %80 = vector.broadcast %79 : vector<8x1xi1> to vector<8x128xi1>
    %81 = vector.shape_cast %78 : vector<1x128xf32> to vector<1x128xf32>
    %82 = vector.broadcast %81 : vector<1x128xf32> to vector<8x128xf32>
    %83 = arith.select %80, %82, %75 : vector<8x128xi1>, vector<8x128xf32>
    %84 = arith.mulf %83, %47 : vector<8x128xf32>
    %85 = arith.addf %45, %84 : vector<8x128xf32>
    %c0_14 = arith.constant 0 : index
    %c256_15 = arith.constant 256 : index
    %86 = vector.load %arg3[%c0_14, %c256_15] : memref<8x512xf32, #tpu.memory_space<vmem>>, vector<8x128xf32>
    %87 = arith.mulf %1, %86 : vector<8x128xf32>
    %c0_16 = arith.constant 0 : index
    %c384 = arith.constant 384 : index
    %88 = vector.load %arg3[%c0_16, %c384] : memref<8x512xf32, #tpu.memory_space<vmem>>, vector<8x128xf32>
    %89 = arith.mulf %87, %88 : vector<8x128xf32>
    %cst_17 = arith.constant 8.000000e-01 : f32
    %90 = vector.broadcast %cst_17 : f32 to vector<8x128xf32>
    %91 = arith.mulf %89, %90 : vector<8x128xf32>
    %c0_18 = arith.constant 0 : index
    %c256_19 = arith.constant 256 : index
    %92 = vector.load %arg3[%c0_18, %c256_19] : memref<8x512xf32, #tpu.memory_space<vmem>>, vector<8x128xf32>
    %cst_20 = arith.constant 5.000000e-01 : f32
    %93 = vector.broadcast %cst_20 : f32 to vector<8x128xf32>
    %94 = arith.mulf %92, %93 : vector<8x128xf32>
    %95 = arith.addf %91, %94 : vector<8x128xf32>
    %96 = arith.mulf %83, %95 : vector<8x128xf32>
    %c0_21 = arith.constant 0 : index
    %c128_22 = arith.constant 128 : index
    %97 = vector.load %arg3[%c0_21, %c128_22] : memref<8x512xf32, #tpu.memory_space<vmem>>, vector<8x128xf32>
    %c0_23 = arith.constant 0 : index
    %c384_24 = arith.constant 384 : index
    %98 = vector.load %arg3[%c0_23, %c384_24] : memref<8x512xf32, #tpu.memory_space<vmem>>, vector<8x128xf32>
    %99 = arith.mulf %97, %98 : vector<8x128xf32>
    %cst_25 = arith.constant -0.699999988 : f32
    %100 = vector.broadcast %cst_25 : f32 to vector<8x128xf32>
    %101 = arith.mulf %99, %100 : vector<8x128xf32>
    %c0_26 = arith.constant 0 : index
    %c256_27 = arith.constant 256 : index
    %102 = vector.load %arg2[%c0_26, %c256_27] : memref<5x384xf32, #tpu.memory_space<vmem>>, vector<5x128xf32>
    %103 = vector.extract_strided_slice %102 {offsets = [0, 0], sizes = [1, 128], strides = [1, 1]} : vector<5x128xf32> to vector<1x128xf32>
    %104 = vector.shape_cast %103 : vector<1x128xf32> to vector<1x128xf32>
    %105 = vector.broadcast %104 : vector<1x128xf32> to vector<8x128xf32>
    %c1_i32_28 = arith.constant 1 : i32
    %106 = vector.broadcast %c1_i32_28 : i32 to vector<8x1xi32>
    %107 = arith.cmpi eq, %0, %106 : vector<8x1xi32>
    %108 = vector.extract_strided_slice %102 {offsets = [1, 0], sizes = [1, 128], strides = [1, 1]} : vector<5x128xf32> to vector<1x128xf32>
    %109 = vector.shape_cast %107 : vector<8x1xi1> to vector<8x1xi1>
    %110 = vector.broadcast %109 : vector<8x1xi1> to vector<8x128xi1>
    %111 = vector.shape_cast %108 : vector<1x128xf32> to vector<1x128xf32>
    %112 = vector.broadcast %111 : vector<1x128xf32> to vector<8x128xf32>
    %113 = arith.select %110, %112, %105 : vector<8x128xi1>, vector<8x128xf32>
    %c2_i32_29 = arith.constant 2 : i32
    %114 = vector.broadcast %c2_i32_29 : i32 to vector<8x1xi32>
    %115 = arith.cmpi eq, %0, %114 : vector<8x1xi32>
    %116 = vector.extract_strided_slice %102 {offsets = [2, 0], sizes = [1, 128], strides = [1, 1]} : vector<5x128xf32> to vector<1x128xf32>
    %117 = vector.shape_cast %115 : vector<8x1xi1> to vector<8x1xi1>
    %118 = vector.broadcast %117 : vector<8x1xi1> to vector<8x128xi1>
    %119 = vector.shape_cast %116 : vector<1x128xf32> to vector<1x128xf32>
    %120 = vector.broadcast %119 : vector<1x128xf32> to vector<8x128xf32>
    %121 = arith.select %118, %120, %113 : vector<8x128xi1>, vector<8x128xf32>
    %c3_i32_30 = arith.constant 3 : i32
    %122 = vector.broadcast %c3_i32_30 : i32 to vector<8x1xi32>
    %123 = arith.cmpi eq, %0, %122 : vector<8x1xi32>
    %124 = vector.extract_strided_slice %102 {offsets = [3, 0], sizes = [1, 128], strides = [1, 1]} : vector<5x128xf32> to vector<1x128xf32>
    %125 = vector.shape_cast %123 : vector<8x1xi1> to vector<8x1xi1>
    %126 = vector.broadcast %125 : vector<8x1xi1> to vector<8x128xi1>
    %127 = vector.shape_cast %124 : vector<1x128xf32> to vector<1x128xf32>
    %128 = vector.broadcast %127 : vector<1x128xf32> to vector<8x128xf32>
    %129 = arith.select %126, %128, %121 : vector<8x128xi1>, vector<8x128xf32>
    %c4_i32_31 = arith.constant 4 : i32
    %130 = vector.broadcast %c4_i32_31 : i32 to vector<8x1xi32>
    %131 = arith.cmpi eq, %0, %130 : vector<8x1xi32>
    %132 = vector.extract_strided_slice %102 {offsets = [4, 0], sizes = [1, 128], strides = [1, 1]} : vector<5x128xf32> to vector<1x128xf32>
    %133 = vector.shape_cast %131 : vector<8x1xi1> to vector<8x1xi1>
    %134 = vector.broadcast %133 : vector<8x1xi1> to vector<8x128xi1>
    %135 = vector.shape_cast %132 : vector<1x128xf32> to vector<1x128xf32>
    %136 = vector.broadcast %135 : vector<1x128xf32> to vector<8x128xf32>
    %137 = arith.select %134, %136, %129 : vector<8x128xi1>, vector<8x128xf32>
    %138 = arith.mulf %137, %101 : vector<8x128xf32>
    %139 = arith.addf %96, %138 : vector<8x128xf32>
    %c0_32 = arith.constant 0 : index
    %c384_33 = arith.constant 384 : index
    %140 = vector.load %arg3[%c0_32, %c384_33] : memref<8x512xf32, #tpu.memory_space<vmem>>, vector<8x128xf32>
    %141 = arith.mulf %99, %140 : vector<8x128xf32>
    %cst_34 = arith.constant -1.100000e+00 : f32
    %142 = vector.broadcast %cst_34 : f32 to vector<8x128xf32>
    %143 = arith.mulf %141, %142 : vector<8x128xf32>
    %144 = arith.mulf %137, %143 : vector<8x128xf32>
    %145 = arith.addf %85, %144 : vector<8x128xf32>
    %c0_35 = arith.constant 0 : index
    %c256_36 = arith.constant 256 : index
    %146 = vector.load %arg3[%c0_35, %c256_36] : memref<8x512xf32, #tpu.memory_space<vmem>>, vector<8x128xf32>
    %147 = arith.mulf %92, %146 : vector<8x128xf32>
    %cst_37 = arith.constant 1.500000e+00 : f32
    %148 = vector.broadcast %cst_37 : f32 to vector<8x128xf32>
    %149 = arith.mulf %147, %148 : vector<8x128xf32>
    %150 = arith.mulf %44, %149 : vector<8x128xf32>
    %151 = arith.addf %139, %150 : vector<8x128xf32>
    %c0_38 = arith.constant 0 : index
    %c0_39 = arith.constant 0 : index
    %152 = vector.load %arg4[%c0_38, %c0_39] : memref<8x256xf32, #tpu.memory_space<vmem>>, vector<8x128xf32>
    tpu.vector_store %arg4[%c0_38, %c0_39], %145 {strides = array<i32>} : memref<8x256xf32, #tpu.memory_space<vmem>>, vector<8x128xf32>,
    %c0_40 = arith.constant 0 : index
    %c128_41 = arith.constant 128 : index
    %153 = vector.load %arg4[%c0_40, %c128_41] : memref<8x256xf32, #tpu.memory_space<vmem>>, vector<8x128xf32>
    tpu.vector_store %arg4[%c0_40, %c128_41], %151 {strides = array<i32>} : memref<8x256xf32, #tpu.memory_space<vmem>>, vector<8x128xf32>,
    return
  }
  func.func @transform_0(%arg0: i32) -> (i32, i32) {
    %c0_i32 = arith.constant 0 : i32
    %c0_i32_0 = arith.constant 0 : i32
    return %arg0, %c0_i32 : i32, i32
  }
  func.func @transform_1(%arg0: i32) -> (i32, i32) {
    %c0_i32 = arith.constant 0 : i32
    %c0_i32_0 = arith.constant 0 : i32
    %c0_i32_1 = arith.constant 0 : i32
    return %c0_i32, %c0_i32_0 : i32, i32
  }
  func.func @transform_2(%arg0: i32) -> (i32, i32) {
    %c0_i32 = arith.constant 0 : i32
    %c0_i32_0 = arith.constant 0 : i32
    return %arg0, %c0_i32 : i32, i32
  }
  func.func @transform_3(%arg0: i32) -> (i32, i32) {
    %c0_i32 = arith.constant 0 : i32
    %c0_i32_0 = arith.constant 0 : i32
    return %arg0, %c0_i32 : i32, i32
  }
}

</mosaic_0001>

<bundles_post_ra>
// kernel: symmetric_tensor_contraction.1
= control target key start
LH: loop header
LB: loop body
LE: loop exit
PB: predicated region body
PF: predicated region fallthrough
CT: control target
= control target key end

     0   :  { %8 = vsyncpa [#allocation3], 0  ;;  %s799_s0 = inlined_call_operand.vmem [shape: s32[12,1], index: 0, kind: input, shape index: {}]   ;;  %s800_s1 = inlined_call_operand.hbm [shape: f32[5,384], index: 1, kind: input, shape index: {}]   ;;  %s801_s2 = inlined_call_operand.hbm [shape: f32[12,512], index: 2, kind: input, shape index: {}]   ;;  %s802_s3 = inlined_call_operand.hbm [shape: f32[12,256], index: 3, kind: output, shape index: {}]  }
   0x1   :  { %9 = vsyncpa [#allocation6], 0 }
   0x2   :  { %11 = vsyncpa [#allocation6 + $0x1], 0 }
   0x3   :  { %12 = vsyncpa [#allocation4], 0 }
   0x4   :  { %14 = vsyncpa [#allocation4 + $0x1], 0  ;;  %s652_s12 = smov 0   ;;  %s654_s13 = smov 0  }
   0x5   :  { %s656_s14 = smov 0   ;;  %s658_s15 = smov 0  }
   0x6 LB: > { %s673_s16 = sadd.s32 4294967295, %s628_s15   ;;  %s419_s17 = sadd.s32 4294967294, %s628_s15   ;;  %s628_s15 = sphi %s658_s15, %s812_s15   ;;  %s624_s14 = sphi %s656_s14, %s811_s14   ;;  %s620_s13 = sphi %s654_s13, %s810_s13   ;;  %s616_s12 = sphi %s652_s12, %s809_s12  }
   0x7   : > { %p87_p0 = scmp.ne.s32.totalorder %s620_s13, %s616_s12  ;;  %p88_p1 = scmp.eq.s32.totalorder %s673_s16, 0 }
   0x8   : > { %p111_p2 = scmp.eq.s32.totalorder %s673_s16, 1  ;;  %p117_p3 = scmp.eq.s32.totalorder %s419_s17, 1 }
   0x9   : > { %p682_p4 = por %p88_p1, %p87_p0  ;;  %p420_p5 = scmp.ge.s32.totalorder %s628_s15, 1 }
   0xa   : > { %p687_p6 = por %p117_p3, %p87_p0  ;;  %p124_p7 = scmp.lt.s32.totalorder %s628_s15, 3 }
   0xb   : > { %s136_s22 = sshll.u32 %s800_s1, 4  ;;  %s630_s24 = smov [#allocation2]   ;;  %s137_s22 = int_to_ptr.hbm [resolvable:$true] %s136_s22 }
   0xc   : > { %p695_p8 = pnand %p420_p5, %p124_p7  ;;  %s138_s25 = sshll.u32 %s630_s24, 4  ;;  %s139_s25 = int_to_ptr.vmem [resolvable:$true] %s138_s25 }
   0xd   : > { %s705_s26 = sadd.s32 1, %s628_s15   ;;  %s74_s27 = sadd.s32 1, %s624_s14 }
   0xe   : > { %p446_p10 = pneg %p695_p8  ;;  %s71_s28 = ssub.s32 %s628_s15, %s705_s26 }
   0xf   : > { %p72_p12 = scmp.eq.s32.totalorder %s71_s28, 0  ;;  %p81_p13 = scmp.ne.s32.totalorder %s624_s14, %s620_s13 }
  0x10   : > { %p447_p11 = pnand %p446_p10, %p88_p1  ;;  %p82_p0 = scmp.eq.s32.totalorder %s628_s15, 0 }
  0x11   : > { %s714_s29 = scalar_select %p72_p12, %s624_s14, %s74_s27  }
  0x12   : > { %449 = dma.hbm_to_vmem [thread:$0]  (!%p447_p11), %s137_s22, 384, %s139_s25, [#allocation3]  }
  0x13   : > { %p718_p3 = por %p111_p2, %p81_p13  ;;  %p459_p5 = scmp.lt.s32.totalorder %s628_s15, 2 }
  0x14   : > { %s156_s4 = sand.u32 1, %s624_s14   ;;  %s436_s5 = sshll.u32 %s628_s15, 5 }
  0x15   : > { %p83_p7 = por %p82_p0, %p81_p13  ;;  %s423_s6 = sshll.u32 %s156_s4, 5 }
  0x16   : > { %s165_s9 = scalar_lea.hbm %s801_s2, %s436_s5  ;;  %s160_s11 = scalar_lea.vmem [#allocation5], %s423_s6 }
  0x17   : > { %s167_s10 = sshll.u32 %s165_s9, 4  ;;  %s169_s17 = sshll.u32 %s160_s11, 4  ;;  %s168_s10 = int_to_ptr.hbm [resolvable:$true] %s167_s10  ;;  %s170_s17 = int_to_ptr.vmem [resolvable:$true] %s169_s17 }
  0x18   : > { %p728_p10 = pnand %p459_p5, %p83_p7  ;;  %s157_s21 = scalar_lea.sflag [#allocation6], %s156_s4 }
  0x19   : > { %s528_s22 = sshra.s32 %s168_s10, 4  ;;  %s535_s28 = scalar_lea.hbm %s801_s2, 64  ;;  %s529_s22 = int_to_ptr.hbm [resolvable:$true] %s528_s22 }
  0x1a   : > { %s530_s24 = scalar_lea.hbm %s529_s22, 32  ;;  %p532_p11 = pneg %p728_p10 }
  0x1b   : > { %p531_p2 = scmp.ne.s32.totalorder %s529_s22, %s530_s24  ;;  %p536_p0 = scmp.lt.s32.totalorder %s529_s22, %s801_s2 }
  0x1c   : > { %p537_p5 = scmp.lt.s32.totalorder %s535_s28, %s530_s24 }
  0x1d   : > { %p533_p12 = pnand %p532_p11, %p531_p2 }
  0x1e   : > { %p538_p7 = por %p537_p5, %p536_p0 }
  0x1f   : > { %p534_p13 = pneg %p533_p12 }
  0x21   : > { %p539_p9 = pnand %p538_p7, %p534_p13 }
  0x23   : > { %542 = shalt.err (!%p539_p9)
}
  0x24   : > { %453 = dma.hbm_to_vmem [thread:$0]  (!%p728_p10), %s168_s10, 512, %s170_s17, %s157_s21  }
  0x25   : > { %178 = sbr.rel (%p695_p8) target bundleno = 193 (0xc1), region = 32 }
  0x2a   : > { %603 = dma.done.wait (%p88_p1), [#allocation3], 384  }
  0x2b   : > { %605 = vsyncadd (%p88_p1), [#allocation3], 4294966912  ;;  %s749_s4 = sand.u32 1, %s620_s13  }
  0x2c   : > { %s428_s7 = sshll.u32 %s749_s4, 5  ;;  %s186_s8 = scalar_lea.sflag [#allocation6], %s749_s4 }
  0x2d   : > { %s189_s9 = scalar_lea.vmem [#allocation5], %s428_s7 }
  0x2e   : > { %607 = dma.done.wait (%p682_p4), %s186_s8, 512  }
  0x2f   : > { %609 = vsyncadd (%p682_p4), %s186_s8, 4294966784  ;;  %p217_p8 = scmp.lt.s32.totalorder %s673_s16, 1  ;;  %v631_v0 = vmov 0   ;;  %v222_v6 = vld [vmem:[%s189_s9] sm:$0xff]  ;;  %v223_v7 = vld [vmem:[%s189_s9 + $0x8] sm:$0xff]  ;;  %s429_s18 = sshll.u32 %s749_s4, 4 }
  0x30   : > { %497 = vset.pattern.permute.xlu1 %v631_v0  ;;  %496 = vset.pattern.permute.xlu0 %v631_v0  ;;  %v225_v8 = vld [vmem:[%s189_s9 + $0x10] sm:$0xff]  ;;  %v224_v9 = vmul.f32 %v223_v7, %v222_v6  ;;  %v278_v11 = vld [vmem:[%s189_s9 + $0x18] sm:$0xff]  ;;  %v229_v12 = vld [vmem:[#allocation2] sm:$0x1f]  ;;  %s437_s21 = sshll.u32 %s673_s16, 4  ;;  %s309_s5 = scalar_lea.sflag [#allocation4], %s749_s4 }
  0x31   : > { %s218_s23 = scalar_select %p217_p8, %s673_s16, 1  ;;  %v277_v10 = vmul.f32 %v225_v8, %v222_v6  ;;  %v265_v13 = vld [vmem:[#allocation2 + $0x8] sm:$0x1f]  ;;  %v286_v16 = vld [vmem:[#allocation2 + $0x10] sm:$0x1f]  ;;  %v284_v19 = vmul.f32 %v278_v11, %v223_v7  ;;  %v230_v20 = vperm.slane %v229_v12, 0  ;;  %v302_v30 = vmul.f32 %v225_v8, %v225_v8 }
  0x32   : > { %v226_v14 = vmul.f32 %v225_v8, %v224_v9  ;;  %v237_v21 = vperm.slane %v229_v12, 1  ;;  %v266_v22 = vperm.slane %v265_v13, 0  ;;  %v267_v23 = vperm.slane %v265_v13, 1  ;;  %s320_s25 = scalar_lea.hbm %s802_s3, %s437_s21  ;;  %s216_s16 = scalar_lea.vmem [#allocation7], %s429_s18 }
  0x33   : > { %s430_s10 = sshll.u32 %s218_s23, 3  ;;  %v279_v18 = vmul.f32 %v278_v11, %v277_v10  ;;  %v287_v24 = vperm.slane %v286_v16, 0  ;;  %v288_v25 = vperm.slane %v286_v16, 1  ;;  %v281_v28 = vmul.f32 0.5, %v225_v8  ;;  %s322_s27 = sshll.u32 %s216_s16, 4  ;;  %s323_s27 = int_to_ptr.vmem [resolvable:$true] %s322_s27 }
  0x34   : > { %s220_s20 = scalar_lea.vmem %s799_s0, %s430_s10  ;;  %v227_v26 = vmul.f32 0.3, %v226_v14  ;;  %v298_v29 = vmul.f32 %v284_v19, %v278_v11  ;;  %v245_v31 = vperm.slane %v229_v12, 2  ;;  %v253_v32 = vperm.slane %v229_v12, 3  ;;  %s324_s28 = sshll.u32 %s320_s25, 4  ;;  %s325_s28 = int_to_ptr.hbm [resolvable:$true] %s324_s28 }
  0x35   : > { %v221_v1 = vld [vmem:[%s220_s20] sm:$0xff]  ;;  %v280_v27 = vmul.f32 0.8, %v279_v18  ;;  %v269_v33 = vperm.slane %v265_v13, 2  ;;  %v290_v34 = vperm.slane %v286_v16, 2  ;;  %v261_v35 = vperm.slane %v229_v12, 4 }
  0x36   : > { %vm247_vm0 = vcmp.eq.s32.totalorder %v221_v1, 3  ;;  %vm231_vm1 = vcmp.eq.s32.totalorder %v221_v1, 1  ;;  %vm255_vm2 = vcmp.eq.s32.totalorder %v221_v1, 4  ;;  %vm239_vm3 = vcmp.eq.s32.totalorder %v221_v1, 2  ;;  %s572_s6 = sshra.s32 %s325_s28, 4  ;;  %s578_s23 = scalar_lea.hbm %s802_s3, 32  ;;  %s573_s6 = int_to_ptr.hbm [resolvable:$true] %s572_s6 }
  0x37   : > { %v248_v2 = vsel %vm247_vm0, 1, %v631_v0  ;;  %v232_v3 = vsel %vm231_vm1, 1, %v631_v0  ;;  %v256_v4 = vsel %vm255_vm2, 1, %v631_v0  ;;  %v240_v5 = vsel %vm239_vm3, 1, %v631_v0  ;;  %s574_s7 = scalar_lea.hbm %s573_s6, 16  ;;  %p579_p10 = scmp.lt.s32.totalorder %s573_s6, %s802_s3 }
  0x38   : > { %250 = vperm.xlu1 %497, %v248_v2   ;;  %234 = vperm.xlu0 %496, %v232_v3   ;;  %v264_v36 = vmul.f32 0.25, %v224_v9  ;;  %v271_v37 = vperm.slane %v265_v13, 3  ;;  %v228_v38 = vadd.f32 %v227_v26, %v222_v6  ;;  %v273_v39 = vperm.slane %v265_v13, 4  ;;  %p575_p1 = scmp.ne.s32.totalorder %s573_s6, %s574_s7  ;;  %p580_p2 = scmp.lt.s32.totalorder %s578_s23, %s574_s7 }
  0x39   : > { %v285_v40 = vmul.f32 -0.7, %v284_v19  ;;  %v292_v41 = vperm.slane %v286_v16, 3  ;;  %v282_v43 = vadd.f32 %v281_v28, %v280_v27  ;;  %v294_v44 = vperm.slane %v286_v16, 4 }
  0x3a   : > { %v299_v45 = vmul.f32 -1.1, %v298_v29  ;;  %v303_v46 = vmul.f32 1.5, %v302_v30  ;;  %p576_p4 = pnand %p575_p1, %p718_p3  ;;  %p581_p11 = por %p580_p2, %p579_p10 }
  0x3c   : > { %p577_p9 = pneg %p576_p4 }
  0x3e   : > { %p582_p12 = pnand %p581_p11, %p577_p9 }
  0x40   : > { %258 = vperm.xlu1 %497, %v256_v4   ;;  %242 = vperm.xlu0 %496, %v240_v5  }
  0xaa   : > { %v251_v15 = vpop.permute.xlu1 %250  ;;  %v235_v17 = vpop.permute.xlu0 %234 }
  0xab   : > { %vm236_vm4 = vcmp.eq.s32.totalorder %v235_v17, 1  ;;  %vm252_vm6 = vcmp.eq.s32.totalorder %v251_v15, 1 }
  0xac   : > { %v238_v48 = vsel %vm236_vm4, %v237_v21, %v230_v20  ;;  %v268_v49 = vsel %vm236_vm4, %v267_v23, %v266_v22  ;;  %v289_v50 = vsel %vm236_vm4, %v288_v25, %v287_v24 }
  0xb2   : > { %v259_v42 = vpop.permute.xlu1 %258  ;;  %v243_v47 = vpop.permute.xlu0 %242 }
  0xb3   : > { %vm244_vm5 = vcmp.eq.s32.totalorder %v243_v47, 1  ;;  %vm260_vm7 = vcmp.eq.s32.totalorder %v259_v42, 1 }
  0xb4   : > { %v246_v51 = vsel %vm244_vm5, %v245_v31, %v238_v48  ;;  %v270_v52 = vsel %vm244_vm5, %v269_v33, %v268_v49  ;;  %v291_v53 = vsel %vm244_vm5, %v290_v34, %v289_v50 }
  0xb5   : > { %v254_v54 = vsel %vm252_vm6, %v253_v32, %v246_v51  ;;  %v272_v55 = vsel %vm252_vm6, %v271_v37, %v270_v52  ;;  %v293_v56 = vsel %vm252_vm6, %v292_v41, %v291_v53 }
  0xb6   : > { %v262_v57 = vsel %vm260_vm7, %v261_v35, %v254_v54  ;;  %v274_v58 = vsel %vm260_vm7, %v273_v39, %v272_v55  ;;  %v295_v59 = vsel %vm260_vm7, %v294_v44, %v293_v56 }
  0xb7   : > { %v263_v60 = vmul.f32 %v262_v57, %v228_v38  ;;  %v275_v61 = vmul.f32 %v274_v58, %v264_v36  ;;  %v283_v62 = vmul.f32 %v282_v43, %v274_v58  ;;  %v296_v63 = vmul.f32 %v295_v59, %v285_v40 }
  0xb8   : > { %v300_v2 = vmul.f32 %v299_v45, %v295_v59  ;;  %v304_v3 = vmul.f32 %v303_v46, %v262_v57 }
  0xb9   : > { %v276_v0 = vadd.f32 %v275_v61, %v263_v60  ;;  %v297_v1 = vadd.f32 %v296_v63, %v283_v62 }
  0xbb   : > { %v301_v4 = vadd.f32 %v300_v2, %v276_v0  ;;  %v305_v5 = vadd.f32 %v304_v3, %v297_v1 }
  0xbd   : > { %306 = vst [vmem:[%s216_s16] sm:$0xff] %v301_v4 }
  0xbe   : > { %307 = vst [vmem:[%s216_s16 + $0x8] sm:$0xff] %v305_v5 }
  0xbf   : > { %585 = shalt.err (!%p582_p12)
}
  0xc0   : > { %444 = dma.vmem_to_hbm [thread:$0]  (%p718_p3), %s323_s27, 256, %s325_s28, %s309_s5  }
  0xc1 PF: > { %s336_s4 = sand.u32 1, %s616_s12   ;;  %p808_p13 = scmp.ge.s32.totalorder %s628_s15, 2 }
  0xc2   : > { %s337_s17 = scalar_lea.sflag [#allocation4], %s336_s4 }
  0xc3   : > { %p455_p0 = pnand %p808_p13, %p687_p6 }
  0xc5   : > { %p456_p5 = pneg %p455_p0 }
  0xc7   : > { %611 = dma.done.wait (%p456_p5), %s337_s17, 256  }
  0xc8   : > { %613 = vsyncadd (%p456_p5), %s337_s17, 4294967040  ;;  %p17_p7 = scmp.ge.s32.totalorder %s705_s26, 4   ;;  %s809_s12 = smov %s620_s13 }
  0xc9   : > { %s810_s13 = smov %s624_s14  ;;  %s811_s14 = smov %s714_s29 }
  0xca   : > { %s812_s15 = smov %s705_s26  ;;  %19 = sbr.rel (!%p17_p7) target bundleno = 6 (0x6), region = 85 }
  0xcf   :  { %343 = vsyncpa [#allocation3], 1 }
  0xd0   :  { %345 = vsyncpa [#allocation3 + $0x1], 1 }
  0xd1   :  { %346 = vsyncpa [#allocation6], 1 }
  0xd2   :  { %348 = vsyncpa [#allocation6 + $0x1], 1 }
  0xd3   :  { %349 = vsyncpa [#allocation4], 1 }
  0xd4   :  { %351 = vsyncpa [#allocation4 + $0x1], 1 }

</bundles_post_ra>
